<compile_context>
chip_gen: v7x
topology: tpu7x:2x2x1
jax: 0.10.0
libtpu: 0.0.40
codegen_flags: <defaults>
</compile_context>

<pallas_src>
import jax
import jax.numpy as jnp
from jax.experimental import pallas as pl
from jax.experimental.pallas import tpu as pltpu

D_PAD = 128   # padded embedding dim (32 -> 128); exact fit for v5e's 128x128 MXU
C_PAD = 128   # padded class dim (10 -> 128): lane-dense output, no masked vst


# ----------------------------------------------------------------------------
# Fused kernel: conv-as-matmul + bias + ReLU, MXU global-average-pool, then the
# linear classifier — all in VMEM, only padded f32 logits go to HBM.
# ----------------------------------------------------------------------------
def fused_kernel(patch_ref, cw_ref, cb_ref, pool_ref, fw_ref, fb_ref, out_ref):
    # patch_ref: (bt*HW, K)   bf16    cw_ref: (K, D_PAD)      bf16
    # cb_ref   : (1, D_PAD)   f32     pool_ref: (bt, bt*HW)   bf16
    # fw_ref   : (D_PAD,C_PAD)bf16    fb_ref: (1, C_PAD)      f32
    # out_ref  : (bt, C_PAD)  f32
    acc = jnp.dot(patch_ref[...], cw_ref[...],
                  preferred_element_type=jnp.float32)          # conv matmul (MXU, bf16)
    h = jnp.maximum(acc + cb_ref[...], 0.0)                    # bias + ReLU (VPU, f32)
    h16 = h.astype(jnp.bfloat16)                               # halve spill/reload bytes
    pooled = jnp.dot(pool_ref[...], h16,
                     preferred_element_type=jnp.float32)       # avg-pool on MXU -> (bt, D_PAD)
    out_ref[...] = (jnp.dot(pooled.astype(jnp.bfloat16), fw_ref[...],
                            preferred_element_type=jnp.float32)
                    + fb_ref[...])                             # classifier -> (bt, C_PAD)


def fused_forward(patches, conv_w, conv_b, pool_mat, fc_w, fc_b,
                  *, batch, hw, bt):
    """patches: (B*HW, K) bf16; returns padded f32 logits (B, C_PAD)."""
    assert batch % bt == 0
    n_tiles = batch // bt
    k = patches.shape[-1]

    # Explicit VMEM budget: double-buffered blocks + f32 conv intermediate h,
    # capped at v7x's 64 MiB physical (raise toward ~96 MiB on v6e for big bt).
    patch_blk = bt * hw * k * patches.dtype.itemsize
    small_ops = (conv_w.size * 2 + fc_w.size * 2 + pool_mat.size * 2
                 + conv_b.size * 4 + fc_b.size * 4 + bt * C_PAD * 4)
    h_bytes = bt * hw * D_PAD * 4
    needed = 2 * (patch_blk + small_ops) + h_bytes
    vmem_limit = int(min(64 << 20, max(16 << 20, 2 * needed)))

    cost = pl.CostEstimate(
        flops=int(2 * batch * hw * k * D_PAD          # conv matmul
                  + 2 * batch * bt * hw * D_PAD       # pooling matmul
                  + 2 * batch * D_PAD * C_PAD),       # classifier matmul
        transcendentals=0,
        bytes_accessed=int(2 * (patches.size + conv_w.size + pool_mat.size
                                + fc_w.size)
                           + 4 * (conv_b.size + fc_b.size + batch * C_PAD)))

    return pl.pallas_call(
        fused_kernel,
        out_shape=jax.ShapeDtypeStruct((batch, C_PAD), jnp.float32),
        grid_spec=pltpu.PrefetchScalarGridSpec(
            num_scalar_prefetch=0,
            grid=(n_tiles,),
            in_specs=[
                pl.BlockSpec((bt * hw, k), lambda i: (i, 0)),     # patches (streamed)
                pl.BlockSpec((k, D_PAD), lambda i: (0, 0)),       # conv weight
                pl.BlockSpec((1, D_PAD), lambda i: (0, 0)),       # conv bias
                pl.BlockSpec((bt, bt * hw), lambda i: (0, 0)),    # per-tile pool matrix
                pl.BlockSpec((D_PAD, C_PAD), lambda i: (0, 0)),   # fc weight
                pl.BlockSpec((1, C_PAD), lambda i: (0, 0)),       # fc bias
            ],
            out_specs=pl.BlockSpec((bt, C_PAD), lambda i: (i, 0)),
        ),
        compiler_params=pltpu.CompilerParams(
            dimension_semantics=("parallel",),
            vmem_limit_bytes=vmem_limit,
            # Fuse the im2col reshape/cast producer into the patch operand.
            allow_input_fusion=[True, False, False, False, False, False]),
        cost_estimate=cost,
    )(patches, conv_w, conv_b, pool_mat, fc_w, fc_b)


# ----------------------------------------------------------------------------
# Glue: im2col (NCHW, k=3, pad=1, stride=1), lane-dense parameter padding.
# ----------------------------------------------------------------------------
def im2col_3x3_same(x):
    """x: (B, C, H, W) -> patches (B, H*W, C*9), feature order = (C, kh, kw)."""
    B, C, H, W = x.shape
    xp = jnp.pad(x, ((0, 0), (0, 0), (1, 1), (1, 1)))
    cols = [xp[:, :, i:i + H, j:j + W] for i in range(3) for j in range(3)]
    p = jnp.stack(cols, axis=2)                  # (B, C, 9, H, W)
    p = jnp.transpose(p, (0, 3, 4, 1, 2))        # (B, H, W, C, 9)
    return p.reshape(B, H * W, C * 9)


def _pick_bt(batch, hw, k, itemsize=2):
    """Batch tile.  Small batches use the full batch (block dims == array dims).
    Larger batches: largest multiple-of-8 divisor (f32 sublane) whose
    double-buffered patch block fits a conservative v7x-sized VMEM budget,
    which also keeps n_tiles >= 2 so both v7x TensorCores are used."""
    if batch <= 8:
        return batch
    budget = 24 << 20          # headroom under v7x's 32 MiB scoped-VMEM default
    best = batch
    for bt in range(8, batch, 8):
        if batch % bt == 0 and 2 * bt * hw * k * itemsize <= budget:
            best = bt
    return best


def finetune_wrapper_forward(x, params):
    """Pallas implementation of FinetuneWrapper.forward(x)."""
    B, Cin, H, W = x.shape
    HW = H * W
    num_classes = params["fc_w"].shape[1]
    k, d = params["conv_w_flat"].shape           # (Cin*9, D)

    # im2col, K left UNPADDED (block last dim == full array dim); bf16 operand.
    patches = im2col_3x3_same(x).reshape(B * HW, k).astype(jnp.bfloat16)

    # Zero-pad parameters to lane-dense widths (padded rows/cols contribute 0);
    # matmul operands in bf16, biases stay f32.
    conv_w = jnp.pad(params["conv_w_flat"],
                     ((0, 0), (0, D_PAD - d))).astype(jnp.bfloat16)      # (K, D_PAD)
    conv_b = jnp.pad(params["conv_b"], ((0, 0), (0, D_PAD - d)))         # (1, D_PAD)
    fc_w = jnp.pad(params["fc_w"],
                   ((0, D_PAD - d), (0, C_PAD - num_classes))
                   ).astype(jnp.bfloat16)                                # (D_PAD, C_PAD)
    fc_b = jnp.pad(params["fc_b"], ((0, 0), (0, C_PAD - num_classes)))   # (1, C_PAD)

    bt = _pick_bt(B, HW, k)

    # Per-tile averaging matrix (bt, bt*HW): the only block the kernel reads;
    # 1/HW is exact in bf16 for power-of-two HW.
    pool_mat = (jnp.kron(jnp.eye(bt, dtype=jnp.float32),
                         jnp.ones((1, HW), dtype=jnp.float32)) / HW
                ).astype(jnp.bfloat16)

    logits_pad = fused_forward(patches, conv_w, conv_b, pool_mat, fc_w, fc_b,
                               batch=B, hw=HW, bt=bt)
    return logits_pad[:, :num_classes]


# ----------------------------------------------------------------------------
# Pure-JAX f32 reference (numerical sanity check)
# ----------------------------------------------------------------------------
def reference_forward(x, params):
    patches = im2col_3x3_same(x)
    h = jnp.maximum(jnp.einsum("bpk,kd->bpd", patches,
                               params["conv_w_flat"]) + params["conv_b"], 0.0)
    h = jnp.mean(h, axis=1)
    return h @ params["fc_w"] + params["fc_b"]


if __name__ == "__main__":
    # Small shapes consistent with the forward: x is an NCHW image batch.
    B, Cin, H, W = 2, 4, 16, 16
    D, NUM_CLASSES = 32, 10

    key = jax.random.PRNGKey(0)
    kx, kw1, kb1, kw2, kb2 = jax.random.split(key, 5)

    x = jax.random.normal(kx, (B, Cin, H, W), dtype=jnp.float32)

    # PyTorch conv weight is (Cout, Cin, 3, 3); flattened to (Cin*9, Cout) to
    # match the im2col feature ordering.
    conv_w = jax.random.normal(kw1, (D, Cin, 3, 3), dtype=jnp.float32) * 0.1
    conv_w_flat = conv_w.reshape(D, Cin * 9).T                  # (Cin*9, D)
    conv_b = jax.random.normal(kb1, (1, D), dtype=jnp.float32) * 0.1
    fc_w = jax.random.normal(kw2, (D, NUM_CLASSES), dtype=jnp.float32) * 0.1
    fc_b = jax.random.normal(kb2, (1, NUM_CLASSES), dtype=jnp.float32) * 0.1

    params = {"conv_w_flat": conv_w_flat, "conv_b": conv_b,
              "fc_w": fc_w, "fc_b": fc_b}

    fwd = jax.jit(finetune_wrapper_forward)
    preds = jax.block_until_ready(fwd(x, params))
    ref = jax.block_until_ready(reference_forward(x, params))

    assert preds.shape == (B, NUM_CLASSES), preds.shape
    # bf16 matmul operands with f32 accumulation -> tolerance loosened vs f32 ref.
    assert jnp.allclose(preds, ref, atol=2e-2, rtol=2e-2), \
        f"max err {jnp.max(jnp.abs(preds - ref))}"

    print("KERNEL_OK")
</pallas_src>

<mosaic_0001>
module attributes {stable_mosaic.version = 11 : i64} {
  func.func @fused_kernel(%arg0: i32, %arg1: memref<512x36xbf16, #tpu.memory_space<vmem>>, %arg2: memref<36x128xbf16, #tpu.memory_space<vmem>>, %arg3: memref<1x128xf32, #tpu.memory_space<vmem>>, %arg4: memref<2x512xbf16, #tpu.memory_space<vmem>>, %arg5: memref<128x128xbf16, #tpu.memory_space<vmem>>, %arg6: memref<1x128xf32, #tpu.memory_space<vmem>>, %arg7: memref<2x128xf32, #tpu.memory_space<vmem>>) attributes {dimension_semantics = [#tpu.dimension_semantics<parallel>], iteration_bounds = array<i64: 1>, scalar_prefetch = 0 : i64, scratch_operands = 0 : i64, tpu.core_type = #tpu.core_type<tc>, window_params = [{transform_indices = @transform_0, window_bounds = array<i64: 512, 36>}, {pipeline_mode = #tpu.pipeline_mode<synchronous>, transform_indices = @transform_1, window_bounds = array<i64: 36, 128>}, {pipeline_mode = #tpu.pipeline_mode<synchronous>, transform_indices = @transform_2, window_bounds = array<i64: 1, 128>}, {pipeline_mode = #tpu.pipeline_mode<synchronous>, transform_indices = @transform_3, window_bounds = array<i64: 2, 512>}, {pipeline_mode = #tpu.pipeline_mode<synchronous>, transform_indices = @transform_4, window_bounds = array<i64: 128, 128>}, {pipeline_mode = #tpu.pipeline_mode<synchronous>, transform_indices = @transform_5, window_bounds = array<i64: 1, 128>}, {transform_indices = @transform_6, window_bounds = array<i64: 2, 128>}]} {
    %c0 = arith.constant 0 : index
    %c0_0 = arith.constant 0 : index
    %0 = vector.load %arg1[%c0, %c0_0] : memref<512x36xbf16, #tpu.memory_space<vmem>>, vector<512x36xbf16>
    %c0_1 = arith.constant 0 : index
    %c0_2 = arith.constant 0 : index
    %1 = vector.load %arg2[%c0_1, %c0_2] : memref<36x128xbf16, #tpu.memory_space<vmem>>, vector<36x128xbf16>
    %cst = arith.constant dense<0.000000e+00> : vector<512x128xf32>
    %2 = tpu.matmul %0, %1, %cst {dimension_numbers = #tpu.dot_dimension_numbers<[1], [0], [0], [1], [0, 0, 1, 1], [], []>} : vector<512x36xbf16>, vector<36x128xbf16>, vector<512x128xf32> -> vector<512x128xf32>
    %c0_3 = arith.constant 0 : index
    %c0_4 = arith.constant 0 : index
    %3 = vector.load %arg3[%c0_3, %c0_4] : memref<1x128xf32, #tpu.memory_space<vmem>>, vector<1x128xf32>
    %4 = vector.broadcast %3 : vector<1x128xf32> to vector<512x128xf32>
    %5 = arith.addf %2, %4 : vector<512x128xf32>
    %cst_5 = arith.constant 0.000000e+00 : f32
    %6 = vector.broadcast %cst_5 : f32 to vector<512x128xf32>
    %7 = arith.maximumf %5, %6 : vector<512x128xf32>
    %8 = arith.truncf %7 : vector<512x128xf32> to vector<512x128xbf16>
    %c0_6 = arith.constant 0 : index
    %c0_7 = arith.constant 0 : index
    %9 = vector.load %arg4[%c0_6, %c0_7] : memref<2x512xbf16, #tpu.memory_space<vmem>>, vector<2x512xbf16>
    %cst_8 = arith.constant dense<0.000000e+00> : vector<2x128xf32>
    %10 = tpu.matmul %9, %8, %cst_8 {dimension_numbers = #tpu.dot_dimension_numbers<[1], [0], [0], [1], [0, 0, 1, 1], [], []>} : vector<2x512xbf16>, vector<512x128xbf16>, vector<2x128xf32> -> vector<2x128xf32>
    %11 = arith.truncf %10 : vector<2x128xf32> to vector<2x128xbf16>
    %c0_9 = arith.constant 0 : index
    %c0_10 = arith.constant 0 : index
    %12 = vector.load %arg5[%c0_9, %c0_10] : memref<128x128xbf16, #tpu.memory_space<vmem>>, vector<128x128xbf16>
    %cst_11 = arith.constant dense<0.000000e+00> : vector<2x128xf32>
    %13 = tpu.matmul %11, %12, %cst_11 {dimension_numbers = #tpu.dot_dimension_numbers<[1], [0], [0], [1], [0, 0, 1, 1], [], []>} : vector<2x128xbf16>, vector<128x128xbf16>, vector<2x128xf32> -> vector<2x128xf32>
    %c0_12 = arith.constant 0 : index
    %c0_13 = arith.constant 0 : index
    %14 = vector.load %arg6[%c0_12, %c0_13] : memref<1x128xf32, #tpu.memory_space<vmem>>, vector<1x128xf32>
    %15 = vector.broadcast %14 : vector<1x128xf32> to vector<2x128xf32>
    %16 = arith.addf %13, %15 : vector<2x128xf32>
    %c0_14 = arith.constant 0 : index
    %c0_15 = arith.constant 0 : index
    %17 = vector.load %arg7[%c0_14, %c0_15] : memref<2x128xf32, #tpu.memory_space<vmem>>, vector<2x128xf32>
    tpu.vector_store %arg7[%c0_14, %c0_15], %16 {strides = array<i32>} : memref<2x128xf32, #tpu.memory_space<vmem>>, vector<2x128xf32>,
    return
  }
  func.func @transform_0(%arg0: i32) -> (i32, i32) {
    %c0_i32 = arith.constant 0 : i32
    %c0_i32_0 = arith.constant 0 : i32
    return %arg0, %c0_i32 : i32, i32
  }
  func.func @transform_1(%arg0: i32) -> (i32, i32) {
    %c0_i32 = arith.constant 0 : i32
    %c0_i32_0 = arith.constant 0 : i32
    %c0_i32_1 = arith.constant 0 : i32
    return %c0_i32, %c0_i32_0 : i32, i32
  }
  func.func @transform_2(%arg0: i32) -> (i32, i32) {
    %c0_i32 = arith.constant 0 : i32
    %c0_i32_0 = arith.constant 0 : i32
    %c0_i32_1 = arith.constant 0 : i32
    return %c0_i32, %c0_i32_0 : i32, i32
  }
  func.func @transform_3(%arg0: i32) -> (i32, i32) {
    %c0_i32 = arith.constant 0 : i32
    %c0_i32_0 = arith.constant 0 : i32
    %c0_i32_1 = arith.constant 0 : i32
    return %c0_i32, %c0_i32_0 : i32, i32
  }
  func.func @transform_4(%arg0: i32) -> (i32, i32) {
    %c0_i32 = arith.constant 0 : i32
    %c0_i32_0 = arith.constant 0 : i32
    %c0_i32_1 = arith.constant 0 : i32
    return %c0_i32, %c0_i32_0 : i32, i32
  }
  func.func @transform_5(%arg0: i32) -> (i32, i32) {
    %c0_i32 = arith.constant 0 : i32
    %c0_i32_0 = arith.constant 0 : i32
    %c0_i32_1 = arith.constant 0 : i32
    return %c0_i32, %c0_i32_0 : i32, i32
  }
  func.func @transform_6(%arg0: i32) -> (i32, i32) {
    %c0_i32 = arith.constant 0 : i32
    %c0_i32_0 = arith.constant 0 : i32
    return %arg0, %c0_i32 : i32, i32
  }
}

</mosaic_0001>

<bundles_post_ra>
// kernel: finetune_wrapper_forward.1
= control target key start
LH: loop header
LB: loop body
LE: loop exit
PB: predicated region body
PF: predicated region fallthrough
CT: control target
= control target key end

     0   :  { %vm276_vm0 = vcmask 293888   ;;  %vm373_vm1 = vcmask 1041408   ;;  %s1672_s0 = inlined_call_operand.vmem [shape: bf16[512,36], index: 0, kind: input, shape index: {}]   ;;  %s1673_s1 = inlined_call_operand.vmem [shape: bf16[36,128], index: 1, kind: input, shape index: {}]   ;;  %s1674_s2 = inlined_call_operand.vmem [shape: f32[1,128], index: 2, kind: input, shape index: {}]   ;;  %s1675_s3 = inlined_call_operand.vmem [shape: bf16[2,512], index: 3, kind: input, shape index: {}]   ;;  %s1676_s4 = inlined_call_operand.vmem [shape: bf16[128,128], index: 4, kind: input, shape index: {}]   ;;  %s1677_s5 = inlined_call_operand.vmem [shape: f32[1,128], index: 5, kind: input, shape index: {}]   ;;  %s1678_s6 = inlined_call_operand.hbm [shape: f32[2,128], index: 6, kind: output, shape index: {}]  }
   0x1   :  { %v1260_v0 = vld [vmem:[%s1673_s1] sm:$0xff]   ;;  %v1261_v1 = vld [vmem:[%s1673_s1 + $0x8] sm:$0xff]   ;;  %v1262_v2 = vld [vmem:[%s1673_s1 + $0x10] ss:$0 sps:$4 sm:$0x33]  }
   0x2   :  { %1165 = vmatprep.subr.bf16.mxu0 %v1260_v0  ;;  %v1263_v3 = vld [vmem:[%s1672_s0] sm:$0xff]   ;;  %v375_v4 = vsel %vm373_vm1, %v1262_v2, 0  ;;  %v1264_v5 = vld [vmem:[%s1672_s0 + $0x8] sm:$0xff]   ;;  %v1265_v6 = vld [vmem:[%s1672_s0 + $0x10] sm:$0xff]  }
   0x3   :  { %1166 = vmatpush3.bf16.msra.mxu0 %v1260_v0  ;;  %1171 = vmatprep.mubr.msk.bf16.mxu0 %vm276_vm0, %v1263_v3  ;;  %v1266_v7 = vld [vmem:[%s1672_s0 + $0x18] sm:$0xff]   ;;  %v1267_v8 = vld [vmem:[%s1672_s0 + $0x20] sm:$0xff]   ;;  %v1268_v9 = vld [vmem:[%s1672_s0 + $0x28] sm:$0xff]  }
   0x4   :  { %1167 = vmatprep.subr.bf16.mxu0 %v1261_v1  ;;  %v1269_v10 = vld [vmem:[%s1672_s0 + $0x30] sm:$0xff]   ;;  %v1270_v11 = vld [vmem:[%s1672_s0 + $0x38] sm:$0xff]   ;;  %v1271_v12 = vld [vmem:[%s1672_s0 + $0x40] sm:$0xff]  }
   0x7   :  { %1168 = vmatpush3.bf16.msra.mxu0 %v1261_v1 }
   0x8   :  { %1255 = vmatprep.subr.msk.bf16.mxu0 %vm373_vm1, %v1262_v2 }
   0xb   :  { %1170 = vmatpush3.bf16.msra.mxu0 %v375_v4 }
   0xe   :  { %1172 = vmatmul.mubr.msk.bf16.vlgmr.msra.gmra.mrb[0].mxu0 %vm276_vm0, %v1264_v5 }
   0xf   :  { %1175 = vmatprep.mubr.msk.bf16.mxu0 %vm276_vm0, %v1265_v6 }
  0x16   :  { %1176 = vmatmul.mubr.msk.bf16.gmra.mrb[4].mxu0 %vm276_vm0, %v1266_v7 }
  0x17   :  { %1179 = vmatprep.mubr.msk.bf16.mxu0 %vm276_vm0, %v1267_v8 }
  0x1e   :  { %1180 = vmatmul.mubr.msk.bf16.gmra.mrb[8].mxu0 %vm276_vm0, %v1268_v9 }
  0x1f   :  { %1183 = vmatprep.mubr.msk.bf16.mxu0 %vm276_vm0, %v1269_v10 }
  0x26   :  { %1184 = vmatmul.mubr.msk.bf16.gmra.mrb[12].mxu0 %vm276_vm0, %v1270_v11 }
  0x27   :  { %1187 = vmatprep.mubr.msk.bf16.mxu0 %vm276_vm0, %v1271_v12 }
  0x28   :  { %11 = vsyncpa [#allocation3], 0  ;;  %v1272_v13 = vld [vmem:[%s1672_s0 + $0x48] sm:$0xff]   ;;  %v1273_v14 = vld [vmem:[%s1672_s0 + $0x50] sm:$0xff]   ;;  %v1327_v36 = vmov 1966171168   ;;  %v775_v38 = vlaneseq }
  0x29   :  { %v1274_v15 = vld [vmem:[%s1672_s0 + $0x58] sm:$0xff]   ;;  %v1275_v16 = vld [vmem:[%s1672_s0 + $0x60] sm:$0xff]   ;;  %v1276_v17 = vld [vmem:[%s1672_s0 + $0x68] sm:$0xff]   ;;  %v773_v37 = vunpack.c.l.s4 %v1327_v36  ;;  %vm1329_vm2 = vmmov 0  }
  0x2a   :  { %v1277_v18 = vld [vmem:[%s1672_s0 + $0x70] sm:$0xff]   ;;  %v1278_v19 = vld [vmem:[%s1672_s0 + $0x78] sm:$0xff]   ;;  %v1279_v20 = vld [vmem:[%s1672_s0 + $0x80] sm:$0xff]   ;;  %v776_v40 = vshrl.u32 %v775_v38, 7 }
  0x2b   :  { %v1280_v21 = vld [vmem:[%s1672_s0 + $0x88] sm:$0xff]   ;;  %v1281_v22 = vld [vmem:[%s1672_s0 + $0x90] sm:$0xff]   ;;  %v1282_v23 = vld [vmem:[%s1672_s0 + $0x98] sm:$0xff]   ;;  %v774_v39 = vunpack.c.0.s8 %v773_v37 }
  0x2c   :  { %v1283_v24 = vld [vmem:[%s1672_s0 + $0xa0] sm:$0xff]   ;;  %v1284_v25 = vld [vmem:[%s1672_s0 + $0xa8] sm:$0xff]   ;;  %v1285_v26 = vld [vmem:[%s1672_s0 + $0xb0] sm:$0xff]  }
  0x2d   :  { %v1286_v27 = vld [vmem:[%s1672_s0 + $0xb8] sm:$0xff]   ;;  %v1287_v28 = vld [vmem:[%s1672_s0 + $0xc0] sm:$0xff]   ;;  %v1288_v29 = vld [vmem:[%s1672_s0 + $0xc8] sm:$0xff]   ;;  %v777_v43 = vsub.s32 %v774_v39, %v776_v40 }
  0x2e   :  { %1188 = vmatmul.mubr.msk.bf16.gmra.mrb[16].mxu0 %vm276_vm0, %v1272_v13  ;;  %v1289_v30 = vld [vmem:[%s1672_s0 + $0xd0] sm:$0xff]   ;;  %v1290_v31 = vld [vmem:[%s1672_s0 + $0xd8] sm:$0xff]   ;;  %v1291_v32 = vld [vmem:[%s1672_s0 + $0xe0] sm:$0xff]  }
  0x2f   :  { %1191 = vmatprep.mubr.msk.bf16.mxu0 %vm276_vm0, %v1273_v14  ;;  %v1292_v33 = vld [vmem:[%s1672_s0 + $0xe8] sm:$0xff]   ;;  %v1293_v34 = vld [vmem:[%s1672_s0 + $0xf0] sm:$0xff]   ;;  %v1294_v35 = vld [vmem:[%s1672_s0 + $0xf8] sm:$0xff]  }
  0x30   :  { %v1067_v41 = vld.sshfl [vmem:[%s1675_s3] sm:$0x33 pattern:$0x75316420] }
  0x31   :  { %v771_v42 = vcombine.high %v1067_v41, %v1067_v41  ;;  %v1508_v45 = vrot.slane %v1067_v41, %v777_v43  ;;  %v1514_v46 = vld [vmem:[%s1674_s2] ss:$0 sm:$0xff] }
  0x33   :  { %v1506_v44 = vrot.slane %v771_v42, %v777_v43 }
  0x35   :  { %824 = vmatprep.mubr.bf16.mxu1 %v1506_v44 }
  0x36   :  { %1192 = vmatmul.mubr.msk.bf16.gmra.mrb[20].mxu0 %vm276_vm0, %v1274_v15 }
  0x37   :  { %1195 = vmatprep.mubr.msk.bf16.mxu0 %vm276_vm0, %v1275_v16 }
  0x3e   :  { %1196 = vmatmul.mubr.msk.bf16.gmra.mrb[24].mxu0 %vm276_vm0, %v1276_v17 }
  0x3f   :  { %1199 = vmatprep.mubr.msk.bf16.mxu0 %vm276_vm0, %v1277_v18 }
  0x46   :  { %1200 = vmatmul.mubr.msk.bf16.gmra.mrb[28].mxu0 %vm276_vm0, %v1278_v19 }
  0x47   :  { %1203 = vmatprep.mubr.msk.bf16.mxu0 %vm276_vm0, %v1279_v20 }
  0x4e   :  { %1204 = vmatmul.mubr.msk.bf16.gmra.mrb[32].mxu0 %vm276_vm0, %v1280_v21 }
  0x4f   :  { %1207 = vmatprep.mubr.msk.bf16.mxu0 %vm276_vm0, %v1281_v22 }
  0x56   :  { %1208 = vmatmul.mubr.msk.bf16.gmra.mrb[36].mxu0 %vm276_vm0, %v1282_v23 }
  0x57   :  { %1211 = vmatprep.mubr.msk.bf16.mxu0 %vm276_vm0, %v1283_v24 }
  0x5e   :  { %1212 = vmatmul.mubr.msk.bf16.gmra.mrb[40].mxu0 %vm276_vm0, %v1284_v25 }
  0x5f   :  { %1215 = vmatprep.mubr.msk.bf16.mxu0 %vm276_vm0, %v1285_v26 }
  0x66   :  { %1216 = vmatmul.mubr.msk.bf16.gmra.mrb[44].mxu0 %vm276_vm0, %v1286_v27 }
  0x67   :  { %1219 = vmatprep.mubr.msk.bf16.mxu0 %vm276_vm0, %v1287_v28 }
  0x6e   :  { %1220 = vmatmul.mubr.msk.bf16.gmra.mrb[48].mxu0 %vm276_vm0, %v1288_v29 }
  0x6f   :  { %1223 = vmatprep.mubr.msk.bf16.mxu0 %vm276_vm0, %v1289_v30 }
  0x76   :  { %1224 = vmatmul.mubr.msk.bf16.gmra.mrb[52].mxu0 %vm276_vm0, %v1290_v31 }
  0x77   :  { %1227 = vmatprep.mubr.msk.bf16.mxu0 %vm276_vm0, %v1291_v32 }
  0x7e   :  { %1228 = vmatmul.mubr.msk.bf16.gmra.mrb[56].mxu0 %vm276_vm0, %v1292_v33 }
  0x7f   :  { %1231 = vmatprep.mubr.msk.bf16.mxu0 %vm276_vm0, %v1293_v34 }
  0x86   :  { %1232 = vmatmul.mubr.msk.bf16.gmra.mrb[60].mxu0 %vm276_vm0, %v1294_v35 }
  0xe1   :  { %v1173_v47 = vpop.f32.mrb[0].mxu0 }
  0xe2   :  { %v420_v48 = vadd.f32 %v1173_v47, %v1514_v46  ;;  %v411_v49 = vpop.f32.mrb[1].mxu0 }
  0xe3   :  { %v412_v50 = vadd.f32 %v1514_v46, %v411_v49  ;;  %v1174_v51 = vpop.f32.mrb[2].mxu0 }
  0xe4   :  { %v423_v52 = vadd.f32 %v1174_v51, %v1514_v46  ;;  %v414_v53 = vpop.f32.mrb[3].mxu0  ;;  %v668_v55 = vmax.f32 %v420_v48, 0.0 }
  0xe5   :  { %v415_v54 = vadd.f32 %v1514_v46, %v414_v53  ;;  %v666_v57 = vmax.f32 %v412_v50, 0.0 }
  0xe6   :  { %v669_v56 = vmax.f32 %v423_v52, 0.0 }
  0xe7   :  { %v667_v58 = vmax.f32 %v415_v54, 0.0 }
  0xe8   :  { %v1520_v59 = vpack.c.bf16 %v669_v56, %v668_v55 }
  0xe9   :  { %v1177_v60 = vpop.f32.mrb[4].mxu0  ;;  %v1522_v61 = vpack.c.bf16 %v667_v58, %v666_v57 }
  0xea   :  { %v436_v62 = vadd.f32 %v1177_v60, %v1514_v46  ;;  %v427_v63 = vpop.f32.mrb[5].mxu0 }
  0xeb   :  { %v428_v0 = vadd.f32 %v1514_v46, %v427_v63  ;;  %v1178_v1 = vpop.f32.mrb[6].mxu0 }
  0xec   :  { %v439_v2 = vadd.f32 %v1178_v1, %v1514_v46  ;;  %v430_v3 = vpop.f32.mrb[7].mxu0  ;;  %v672_v5 = vmax.f32 %v436_v62, 0.0 }
  0xed   :  { %v431_v4 = vadd.f32 %v1514_v46, %v430_v3  ;;  %v670_v7 = vmax.f32 %v428_v0, 0.0 }
  0xee   :  { %v673_v6 = vmax.f32 %v439_v2, 0.0 }
  0xef   :  { %v671_v8 = vmax.f32 %v431_v4, 0.0 }
  0xf0   :  { %v1528_v9 = vpack.c.bf16 %v673_v6, %v672_v5 }
  0xf1   :  { %v1530_v10 = vpack.c.bf16 %v671_v8, %v670_v7  ;;  %v1181_v11 = vpop.f32.mrb[8].mxu0 }
  0xf2   :  { %v452_v12 = vadd.f32 %v1181_v11, %v1514_v46  ;;  %v443_v13 = vpop.f32.mrb[9].mxu0 }
  0xf3   :  { %v444_v14 = vadd.f32 %v1514_v46, %v443_v13  ;;  %v1182_v15 = vpop.f32.mrb[10].mxu0 }
  0xf4   :  { %v455_v16 = vadd.f32 %v1182_v15, %v1514_v46  ;;  %v446_v17 = vpop.f32.mrb[11].mxu0  ;;  %v676_v19 = vmax.f32 %v452_v12, 0.0 }
  0xf5   :  { %v447_v18 = vadd.f32 %v1514_v46, %v446_v17  ;;  %v674_v21 = vmax.f32 %v444_v14, 0.0 }
  0xf6   :  { %v677_v20 = vmax.f32 %v455_v16, 0.0 }
  0xf7   :  { %v675_v22 = vmax.f32 %v447_v18, 0.0 }
  0xf8   :  { %v1536_v23 = vpack.c.bf16 %v677_v20, %v676_v19 }
  0xf9   :  { %v1538_v24 = vpack.c.bf16 %v675_v22, %v674_v21  ;;  %v1185_v25 = vpop.f32.mrb[12].mxu0 }
  0xfa   :  { %v468_v26 = vadd.f32 %v1185_v25, %v1514_v46  ;;  %v459_v27 = vpop.f32.mrb[13].mxu0 }
  0xfb   :  { %v460_v28 = vadd.f32 %v1514_v46, %v459_v27  ;;  %v1186_v29 = vpop.f32.mrb[14].mxu0 }
  0xfc   :  { %v471_v30 = vadd.f32 %v1186_v29, %v1514_v46  ;;  %v462_v31 = vpop.f32.mrb[15].mxu0  ;;  %v680_v33 = vmax.f32 %v468_v26, 0.0 }
  0xfd   :  { %v463_v32 = vadd.f32 %v1514_v46, %v462_v31  ;;  %v678_v35 = vmax.f32 %v460_v28, 0.0 }
  0xfe   :  { %v681_v34 = vmax.f32 %v471_v30, 0.0 }
  0xff   :  { %v679_v36 = vmax.f32 %v463_v32, 0.0 }
 0x100   :  { %v1544_v37 = vpack.c.bf16 %v681_v34, %v680_v33 }
 0x101   :  { %v1546_v38 = vpack.c.bf16 %v679_v36, %v678_v35  ;;  %v1189_v39 = vpop.f32.mrb[16].mxu0 }
 0x102   :  { %v484_v40 = vadd.f32 %v1189_v39, %v1514_v46  ;;  %v475_v41 = vpop.f32.mrb[17].mxu0 }
 0x103   :  { %v476_v42 = vadd.f32 %v1514_v46, %v475_v41  ;;  %v1190_v43 = vpop.f32.mrb[18].mxu0 }
 0x104   :  { %v487_v47 = vadd.f32 %v1190_v43, %v1514_v46  ;;  %v478_v48 = vpop.f32.mrb[19].mxu0  ;;  %v684_v50 = vmax.f32 %v484_v40, 0.0 }
 0x105   :  { %v479_v49 = vadd.f32 %v1514_v46, %v478_v48  ;;  %v682_v52 = vmax.f32 %v476_v42, 0.0 }
 0x106   :  { %v685_v51 = vmax.f32 %v487_v47, 0.0 }
 0x107   :  { %v683_v53 = vmax.f32 %v479_v49, 0.0 }
 0x108   :  { %v739_v54 = vpack.c.bf16 %v685_v51, %v684_v50 }
 0x109   :  { %v1193_v55 = vpop.f32.mrb[20].mxu0  ;;  %v738_v56 = vpack.c.bf16 %v683_v53, %v682_v52  ;;  %v787_v52 = vcombine.high %v1506_v44, %v1506_v44 }
 0x10a   :  { %v500_v57 = vadd.f32 %v1193_v55, %v1514_v46  ;;  %v491_v58 = vpop.f32.mrb[21].mxu0 }
 0x10b   :  { %v492_v60 = vadd.f32 %v1514_v46, %v491_v58  ;;  %v1194_v62 = vpop.f32.mrb[22].mxu0  ;;  %1112 = vmatprep.subr.bf16.mxu1 %v738_v56 }
 0x10c   :  { %v503_v63 = vadd.f32 %v1194_v62, %v1514_v46  ;;  %v494_v0 = vpop.f32.mrb[23].mxu0  ;;  %1113 = vmatpush3.bf16.msra.mxu1 %v1522_v61  ;;  %v688_v2 = vmax.f32 %v500_v57, 0.0 }
 0x10d   :  { %v495_v1 = vadd.f32 %v1514_v46, %v494_v0  ;;  %1114 = vmatprep.subr.bf16.mxu1 %v739_v54  ;;  %v686_v4 = vmax.f32 %v492_v60, 0.0 }
 0x10e   :  { %v689_v3 = vmax.f32 %v503_v63, 0.0 }
 0x10f   :  { %v687_v5 = vmax.f32 %v495_v1, 0.0 }
 0x110   :  { %v741_v6 = vpack.c.bf16 %v689_v3, %v688_v2  ;;  %1115 = vmatpush3.bf16.msra.mxu1 %v1520_v59 }
 0x111   :  { %v740_v7 = vpack.c.bf16 %v687_v5, %v686_v4  ;;  %v1197_v8 = vpop.f32.mrb[24].mxu0 }
 0x112   :  { %v516_v11 = vadd.f32 %v1197_v8, %v1514_v46  ;;  %v507_v12 = vpop.f32.mrb[25].mxu0 }
 0x113   :  { %v508_v13 = vadd.f32 %v1514_v46, %v507_v12  ;;  %v1198_v14 = vpop.f32.mrb[26].mxu0  ;;  %1116 = vmatprep.subr.bf16.mxu1 %v740_v7 }
 0x114   :  { %v519_v61 = vadd.f32 %v1198_v14, %v1514_v46  ;;  %v510_v15 = vpop.f32.mrb[27].mxu0  ;;  %1117 = vmatpush3.bf16.msra.mxu1 %v1530_v10  ;;  %v692_v17 = vmax.f32 %v516_v11, 0.0 }
 0x115   :  { %v511_v16 = vadd.f32 %v1514_v46, %v510_v15  ;;  %1118 = vmatprep.subr.bf16.mxu1 %v741_v6  ;;  %v690_v59 = vmax.f32 %v508_v13, 0.0 }
 0x116   :  { %v693_v18 = vmax.f32 %v519_v61, 0.0 }
 0x117   :  { %v691_v19 = vmax.f32 %v511_v16, 0.0 }
 0x118   :  { %v743_v20 = vpack.c.bf16 %v693_v18, %v692_v17  ;;  %1119 = vmatpush3.bf16.msra.mxu1 %v1528_v9 }
 0x119   :  { %v742_v21 = vpack.c.bf16 %v691_v19, %v690_v59  ;;  %v1201_v22 = vpop.f32.mrb[28].mxu0 }
 0x11a   :  { %v532_v25 = vadd.f32 %v1201_v22, %v1514_v46  ;;  %v523_v26 = vpop.f32.mrb[29].mxu0 }
 0x11b   :  { %v524_v27 = vadd.f32 %v1514_v46, %v523_v26  ;;  %v1202_v28 = vpop.f32.mrb[30].mxu0  ;;  %1120 = vmatprep.subr.bf16.mxu1 %v742_v21 }
 0x11c   :  { %v535_v10 = vadd.f32 %v1202_v28, %v1514_v46  ;;  %v526_v29 = vpop.f32.mrb[31].mxu0  ;;  %1121 = vmatpush3.bf16.msra.mxu1 %v1538_v24  ;;  %v696_v31 = vmax.f32 %v532_v25, 0.0 }
 0x11d   :  { %v527_v30 = vadd.f32 %v1514_v46, %v526_v29  ;;  %1122 = vmatprep.subr.bf16.mxu1 %v743_v20  ;;  %v694_v9 = vmax.f32 %v524_v27, 0.0 }
 0x11e   :  { %v697_v32 = vmax.f32 %v535_v10, 0.0 }
 0x11f   :  { %v695_v33 = vmax.f32 %v527_v30, 0.0 }
 0x120   :  { %v745_v34 = vpack.c.bf16 %v697_v32, %v696_v31  ;;  %1123 = vmatpush3.bf16.msra.mxu1 %v1536_v23 }
 0x121   :  { %v744_v35 = vpack.c.bf16 %v695_v33, %v694_v9  ;;  %v1205_v36 = vpop.f32.mrb[32].mxu0 }
 0x122   :  { %v548_v39 = vadd.f32 %v1205_v36, %v1514_v46  ;;  %v539_v40 = vpop.f32.mrb[33].mxu0 }
 0x123   :  { %v540_v41 = vadd.f32 %v1514_v46, %v539_v40  ;;  %v1206_v42 = vpop.f32.mrb[34].mxu0  ;;  %1124 = vmatprep.subr.bf16.mxu1 %v744_v35 }
 0x124   :  { %v551_v24 = vadd.f32 %v1206_v42, %v1514_v46  ;;  %v542_v43 = vpop.f32.mrb[35].mxu0  ;;  %1125 = vmatpush3.bf16.msra.mxu1 %v1546_v38  ;;  %v700_v48 = vmax.f32 %v548_v39, 0.0 }
 0x125   :  { %v543_v47 = vadd.f32 %v1514_v46, %v542_v43  ;;  %1126 = vmatprep.subr.bf16.mxu1 %v745_v34  ;;  %v698_v23 = vmax.f32 %v540_v41, 0.0 }
 0x126   :  { %v701_v49 = vmax.f32 %v551_v24, 0.0 }
 0x127   :  { %v699_v50 = vmax.f32 %v543_v47, 0.0 }
 0x128   :  { %v1575_v51 = vpack.c.bf16 %v701_v49, %v700_v48  ;;  %1127 = vmatpush3.bf16.msra.mxu1 %v1544_v37 }
 0x129   :  { %v1580_v53 = vpack.c.bf16 %v699_v50, %v698_v23  ;;  %v1209_v54 = vpop.f32.mrb[36].mxu0 }
 0x12a   :  { %v564_v55 = vadd.f32 %v1209_v54, %v1514_v46  ;;  %v555_v38 = vpop.f32.mrb[37].mxu0 }
 0x12b   :  { %v556_v56 = vadd.f32 %v1514_v46, %v555_v38  ;;  %v1210_v57 = vpop.f32.mrb[38].mxu0  ;;  %825 = vmatmul.mubr.bf16.vlgmr.msra.gmra.mrb[0].mxu1 %v1508_v45 }
 0x12c   :  { %v567_v58 = vadd.f32 %v1210_v57, %v1514_v46  ;;  %v558_v60 = vpop.f32.mrb[39].mxu0  ;;  %864 = vmatprep.mubr.bf16.mxu1 %v787_v52  ;;  %v704_v62 = vmax.f32 %v564_v55, 0.0 }
 0x12d   :  { %v559_v37 = vadd.f32 %v1514_v46, %v558_v60  ;;  %v702_v44 = vmax.f32 %v556_v56, 0.0 }
 0x12e   :  { %v705_v63 = vmax.f32 %v567_v58, 0.0 }
 0x12f   :  { %v703_v0 = vmax.f32 %v559_v37, 0.0 }
 0x130   :  { %v1587_v1 = vpack.c.bf16 %v705_v63, %v704_v62 }
 0x131   :  { %v1589_v2 = vpack.c.bf16 %v703_v0, %v702_v44  ;;  %v1213_v3 = vpop.f32.mrb[40].mxu0 }
 0x132   :  { %v580_v4 = vadd.f32 %v1213_v3, %v1514_v46  ;;  %v571_v5 = vpop.f32.mrb[41].mxu0 }
 0x133   :  { %v572_v6 = vadd.f32 %v1514_v46, %v571_v5  ;;  %v1214_v7 = vpop.f32.mrb[42].mxu0 }
 0x134   :  { %v583_v8 = vadd.f32 %v1214_v7, %v1514_v46  ;;  %v574_v11 = vpop.f32.mrb[43].mxu0  ;;  %v708_v13 = vmax.f32 %v580_v4, 0.0 }
 0x135   :  { %v575_v12 = vadd.f32 %v1514_v46, %v574_v11  ;;  %v706_v61 = vmax.f32 %v572_v6, 0.0 }
 0x136   :  { %v709_v14 = vmax.f32 %v583_v8, 0.0 }
 0x137   :  { %v707_v15 = vmax.f32 %v575_v12, 0.0 }
 0x138   :  { %v1595_v16 = vpack.c.bf16 %v709_v14, %v708_v13 }
 0x139   :  { %v1597_v17 = vpack.c.bf16 %v707_v15, %v706_v61  ;;  %v1217_v18 = vpop.f32.mrb[44].mxu0 }
 0x13a   :  { %v596_v59 = vadd.f32 %v1217_v18, %v1514_v46  ;;  %v587_v19 = vpop.f32.mrb[45].mxu0 }
 0x13b   :  { %v588_v20 = vadd.f32 %v1514_v46, %v587_v19  ;;  %v1218_v21 = vpop.f32.mrb[46].mxu0 }
 0x13c   :  { %v599_v22 = vadd.f32 %v1218_v21, %v1514_v46  ;;  %v590_v25 = vpop.f32.mrb[47].mxu0  ;;  %v712_v27 = vmax.f32 %v596_v59, 0.0 }
 0x13d   :  { %v591_v26 = vadd.f32 %v1514_v46, %v590_v25  ;;  %v710_v10 = vmax.f32 %v588_v20, 0.0 }
 0x13e   :  { %v713_v28 = vmax.f32 %v599_v22, 0.0 }
 0x13f   :  { %v711_v29 = vmax.f32 %v591_v26, 0.0 }
 0x140   :  { %v1603_v30 = vpack.c.bf16 %v713_v28, %v712_v27 }
 0x141   :  { %v1605_v31 = vpack.c.bf16 %v711_v29, %v710_v10  ;;  %v1221_v32 = vpop.f32.mrb[48].mxu0  ;;  %v786_v10 = vcombine.high %v1508_v45, %v1508_v45  ;;  %v1297_v45 = vld [vmem:[%s1676_s4 + $0x10] sm:$0xff]   ;;  %v1298_v29 = vld [vmem:[%s1676_s4 + $0x18] sm:$0xff]  }
 0x142   :  { %v612_v9 = vadd.f32 %v1221_v32, %v1514_v46  ;;  %v603_v33 = vpop.f32.mrb[49].mxu0  ;;  %v1301_v32 = vld [vmem:[%s1676_s4 + $0x30] sm:$0xff]  }
 0x143   :  { %v604_v34 = vadd.f32 %v1514_v46, %v603_v33  ;;  %v1222_v35 = vpop.f32.mrb[50].mxu0 }
 0x144   :  { %v615_v36 = vadd.f32 %v1222_v35, %v1514_v46  ;;  %v606_v39 = vpop.f32.mrb[51].mxu0  ;;  %v716_v41 = vmax.f32 %v612_v9, 0.0  ;;  %v1302_v9 = vld [vmem:[%s1676_s4 + $0x38] sm:$0xff]  }
 0x145   :  { %v607_v40 = vadd.f32 %v1514_v46, %v606_v39  ;;  %v714_v24 = vmax.f32 %v604_v34, 0.0 }
 0x146   :  { %v717_v42 = vmax.f32 %v615_v36, 0.0 }
 0x147   :  { %v715_v43 = vmax.f32 %v607_v40, 0.0 }
 0x148   :  { %v755_v47 = vpack.c.bf16 %v717_v42, %v716_v41 }
 0x149   :  { %v754_v48 = vpack.c.bf16 %v715_v43, %v714_v24  ;;  %v1225_v49 = vpop.f32.mrb[52].mxu0 }
 0x14a   :  { %v628_v23 = vadd.f32 %v1225_v49, %v1514_v46  ;;  %v619_v50 = vpop.f32.mrb[53].mxu0  ;;  %v1068_v49 = vld [vmem:[%s1677_s5] ss:$0 sm:$0xff] }
 0x14b   :  { %v620_v52 = vadd.f32 %v1514_v46, %v619_v50  ;;  %v1226_v54 = vpop.f32.mrb[54].mxu0  ;;  %1134 = vmatprep.subr.bf16.mxu1 %v754_v48 }
 0x14c   :  { %v631_v55 = vadd.f32 %v1226_v54, %v1514_v46  ;;  %v622_v38 = vpop.f32.mrb[55].mxu0  ;;  %1135 = vmatpush3.bf16.msra.mxu1 %v1580_v53  ;;  %v720_v57 = vmax.f32 %v628_v23, 0.0 }
 0x14d   :  { %v623_v56 = vadd.f32 %v1514_v46, %v622_v38  ;;  %1136 = vmatprep.subr.bf16.mxu1 %v755_v47  ;;  %v718_v60 = vmax.f32 %v620_v52, 0.0 }
 0x14e   :  { %v721_v58 = vmax.f32 %v631_v55, 0.0 }
 0x14f   :  { %v719_v37 = vmax.f32 %v623_v56, 0.0 }
 0x150   :  { %v757_v62 = vpack.c.bf16 %v721_v58, %v720_v57  ;;  %1137 = vmatpush3.bf16.msra.mxu1 %v1575_v51 }
 0x151   :  { %v756_v63 = vpack.c.bf16 %v719_v37, %v718_v60  ;;  %v1229_v44 = vpop.f32.mrb[56].mxu0 }
 0x152   :  { %v644_v0 = vadd.f32 %v1229_v44, %v1514_v46  ;;  %v635_v3 = vpop.f32.mrb[57].mxu0 }
 0x153   :  { %v636_v4 = vadd.f32 %v1514_v46, %v635_v3  ;;  %v1230_v5 = vpop.f32.mrb[58].mxu0  ;;  %1138 = vmatprep.subr.bf16.mxu1 %v756_v63 }
 0x154   :  { %v647_v53 = vadd.f32 %v1230_v5, %v1514_v46  ;;  %v638_v6 = vpop.f32.mrb[59].mxu0  ;;  %1139 = vmatpush3.bf16.msra.mxu1 %v1589_v2  ;;  %v724_v8 = vmax.f32 %v644_v0, 0.0 }
 0x155   :  { %v639_v7 = vadd.f32 %v1514_v46, %v638_v6  ;;  %1140 = vmatprep.subr.bf16.mxu1 %v757_v62  ;;  %v722_v51 = vmax.f32 %v636_v4, 0.0 }
 0x156   :  { %v725_v11 = vmax.f32 %v647_v53, 0.0 }
 0x157   :  { %v723_v12 = vmax.f32 %v639_v7, 0.0 }
 0x158   :  { %v759_v13 = vpack.c.bf16 %v725_v11, %v724_v8  ;;  %1141 = vmatpush3.bf16.msra.mxu1 %v1587_v1 }
 0x159   :  { %v758_v14 = vpack.c.bf16 %v723_v12, %v722_v51  ;;  %v1233_v61 = vpop.f32.mrb[60].mxu0 }
 0x15a   :  { %v660_v15 = vadd.f32 %v1233_v61, %v1514_v46  ;;  %v651_v18 = vpop.f32.mrb[61].mxu0 }
 0x15b   :  { %v652_v59 = vadd.f32 %v1514_v46, %v651_v18  ;;  %v1234_v19 = vpop.f32.mrb[62].mxu0  ;;  %1142 = vmatprep.subr.bf16.mxu1 %v758_v14 }
 0x15c   :  { %v663_v2 = vadd.f32 %v1234_v19, %v1514_v46  ;;  %v654_v20 = vpop.f32.mrb[63].mxu0  ;;  %1143 = vmatpush3.bf16.msra.mxu1 %v1597_v17  ;;  %v728_v22 = vmax.f32 %v660_v15, 0.0  ;;  %v1328_v17 = vmov 0.0  }
 0x15d   :  { %v655_v21 = vadd.f32 %v1514_v46, %v654_v20  ;;  %1144 = vmatprep.subr.bf16.mxu1 %v759_v13  ;;  %v726_v1 = vmax.f32 %v652_v59, 0.0  ;;  %v1295_v46 = vld [vmem:[%s1676_s4] sm:$0xff]  }
 0x15e   :  { %v729_v25 = vmax.f32 %v663_v2, 0.0 }
 0x15f   :  { %v727_v26 = vmax.f32 %v655_v21, 0.0 }
 0x160   :  { %v761_v27 = vpack.c.bf16 %v729_v25, %v728_v22  ;;  %1145 = vmatpush3.bf16.msra.mxu1 %v1595_v16  ;;  %v1296_v16 = vld [vmem:[%s1676_s4 + $0x8] sm:$0xff]  }
 0x161   :  { %v760_v28 = vpack.c.bf16 %v727_v26, %v726_v1 }
 0x163   :  { %1146 = vmatprep.subr.bf16.mxu1 %v760_v28 }
 0x164   :  { %1147 = vmatpush3.bf16.msra.mxu1 %v1605_v31  ;;  %v1300_v31 = vld [vmem:[%s1676_s4 + $0x28] sm:$0xff]  }
 0x165   :  { %1148 = vmatprep.subr.bf16.mxu1 %v761_v27 }
 0x168   :  { %1149 = vmatpush3.bf16.msra.mxu1 %v1603_v30  ;;  %v1299_v30 = vld [vmem:[%s1676_s4 + $0x20] sm:$0xff]   ;;  %s1330_s4 = smov [#allocation2]  }
 0x169   :  { %1235 = vmatprep.subr.bf16.mxu1 %v1328_v17  ;;  %s991_s10 = sshll.u32 %s1330_s4, 4  ;;  %s992_s10 = int_to_ptr.vmem [resolvable:$true] %s991_s10 }
 0x16a   :  { %s1303_s11 = scalar_lea.vmem %s992_s10, 32  ;;  %p1308_p1 = scmp.lt.s32.totalorder %s992_s10, %s992_s10 }
 0x16b   :  { %865 = vmatmul.mubr.bf16.vlgmr.msra.gmra.mrb[4].mxu1 %v786_v10  ;;  %p1304_p0 = scmp.ne.s32.totalorder %s992_s10, %s1303_s11  ;;  %p1309_p2 = scmp.lt.s32.totalorder %s1303_s11, %s1303_s11 }
 0x16c   :  { %1236 = vmatpush3.bf16.msra.mxu1 %v1295_v46  ;;  %1251 = vmatprep.mubr.msk.bf16.mxu1 %vm1329_vm2, %v1328_v17 }
 0x16d   :  { %1237 = vmatprep.subr.bf16.mxu1 %v1328_v17  ;;  %p1310_p3 = por %p1309_p2, %p1308_p1 }
 0x16f   :  { %p1311_p4 = pnand %p1310_p3, %p1304_p0 }
 0x170   :  { %1238 = vmatpush3.bf16.msra.mxu1 %v1296_v16 }
 0x171   :  { %1239 = vmatprep.subr.bf16.mxu1 %v1328_v17 }
 0x174   :  { %1240 = vmatpush3.bf16.msra.mxu1 %v1297_v45 }
 0x175   :  { %1241 = vmatprep.subr.bf16.mxu1 %v1328_v17 }
 0x178   :  { %1242 = vmatpush3.bf16.msra.mxu1 %v1298_v29 }
 0x179   :  { %1243 = vmatprep.subr.bf16.mxu1 %v1328_v17 }
 0x17c   :  { %1244 = vmatpush3.bf16.msra.mxu1 %v1299_v30 }
 0x17d   :  { %1245 = vmatprep.subr.bf16.mxu1 %v1328_v17 }
 0x180   :  { %1246 = vmatpush3.bf16.msra.mxu1 %v1300_v31 }
 0x181   :  { %1247 = vmatprep.subr.bf16.mxu1 %v1328_v17 }
 0x184   :  { %1248 = vmatpush3.bf16.msra.mxu1 %v1301_v32 }
 0x185   :  { %1249 = vmatprep.subr.bf16.mxu1 %v1328_v17 }
 0x188   :  { %1250 = vmatpush3.bf16.msra.mxu1 %v1302_v9 }
 0x1fe   :  { %v1128_v33 = vpop.f32.mrb[0].mxu1 }
 0x1ff   :  { %v1129_v34 = vpop.f32.mrb[1].mxu1 }
 0x200   :  { %v1130_v35 = vadd.f32 %v1129_v34, %v1128_v33  ;;  %v1131_v36 = vpop.f32.mrb[2].mxu1 }
 0x201   :  { %v1132_v39 = vpop.f32.mrb[3].mxu1 }
 0x23e   :  { %v1150_v40 = vpop.f32.mrb[4].mxu1 }
 0x23f   :  { %v1151_v41 = vpop.f32.mrb[5].mxu1 }
 0x240   :  { %v1152_v42 = vadd.f32 %v1151_v41, %v1150_v40  ;;  %v1153_v24 = vpop.f32.mrb[6].mxu1 }
 0x241   :  { %v1154_v43 = vpop.f32.mrb[7].mxu1 }
 0x242   :  { %v867_v47 = vadd.f32 %v1152_v42, %v1130_v35 }
 0x244   :  { %v872_v48 = vpack.c.bf16 %v867_v47, %v867_v47 }
 0x246   :  { %1252 = vmatmul.mubr.bf16.vlgmr.msra.gmra.mrb[8].mxu1 %v872_v48 }
 0x319   :  { %v978_v23 = vpop.f32.mrb[8].mxu1 }
 0x31a   :  { %v979_v50 = vadd.f32 %v1068_v49, %v978_v23  ;;  %v1253_v52 = vpop.f32.mrb[9].mxu1 }
 0x31b   :  { %v981_v54 = vpop.f32.mrb[10].mxu1 }
 0x31c   :  { %984 = vst [vmem:[#allocation2] sm:$0x3] %v979_v50  ;;  %v1254_v55 = vpop.f32.mrb[11].mxu1 }
 0x31d   :  { %1314 = shalt.err (!%p1311_p4)
}
 0x31e   :  { %s1315_s5 = scalar_lea.hbm %s1678_s6, 32 }
 0x31f   :  { %p1316_p5 = scmp.ne.s32.totalorder %s1678_s6, %s1315_s5  ;;  %p1319_p6 = scmp.lt.u32.totalorder %s1315_s5, %s1678_s6 }
 0x321   :  { %p1321_p7 = pnand %p1319_p6, %p1316_p5 }
 0x323   :  { %1324 = shalt.err (!%p1321_p7)
}
 0x324   :  { %994 = dma.vmem_to_hbm [thread:$0]  %s992_s10, 32, %s1678_s6, [#allocation3]  }
 0x325   :  { %1325 = dma.done.wait [#allocation3], 32  }
 0x326   :  { %1326 = vsyncadd [#allocation3], 4294967264 }
 0x327   :  { %998 = vsyncpa [#allocation3], 1 }

</bundles_post_ra>
